<compile_context>
chip_gen: v7x
topology: tpu7x:2x2x1
jax: 0.10.0
libtpu: 0.0.40
codegen_flags: <defaults>
</compile_context>

<pallas_src>
import jax
import jax.numpy as jnp
from jax.experimental import pallas as pl
from jax.experimental.pallas import tpu as pltpu


def _mlp_kernel(x_ref, w1_ref, w2_ref, o_ref):
    # Two MXU matmuls + VPU ReLU; biases are folded into the weight matrices.
    h = jnp.dot(x_ref[...], w1_ref[...], preferred_element_type=jnp.float32)
    h = jnp.maximum(h, 0.0)  # ReLU (the constant-1 bias column survives: relu(1)=1)
    y = jnp.dot(h, w2_ref[...], preferred_element_type=jnp.float32)
    o_ref[...] = y.astype(o_ref.dtype)


def _round_up(n, m):
    return ((n + m - 1) // m) * m


def iris_classifier_forward(x, w1, b1, w2, b2, *, tile_b=512):
    """x: (B, input_dim) f32; w1: (input_dim, hidden); b1: (hidden,);
    w2: (hidden, output_dim); b2: (output_dim,). Returns (B, output_dim) f32."""
    B, input_dim = x.shape
    hidden = w1.shape[1]
    out_dim = w2.shape[1]

    H_PAD = 128   # lane-dense hidden width
    O_PAD = 128   # lane-dense output width
    k_aug = input_dim + 1  # extra ones column for bias folding

    # --- Fold biases / pad weights (done once in the wrapper, outside the hot path).
    # W1' = [[W1, 0_col->1-unit], [b1, 1]]  shape (input_dim+1, 128)
    w1_aug = jnp.zeros((k_aug, H_PAD), jnp.float32)
    w1_aug = w1_aug.at[:input_dim, :hidden].set(w1.astype(jnp.float32))
    w1_aug = w1_aug.at[input_dim, :hidden].set(b1.astype(jnp.float32))
    w1_aug = w1_aug.at[input_dim, hidden].set(1.0)  # constant-1 hidden unit carries b2

    # W2' = [[W2], [b2], [0...]]  shape (128, 128)
    w2_aug = jnp.zeros((H_PAD, O_PAD), jnp.float32)
    w2_aug = w2_aug.at[:hidden, :out_dim].set(w2.astype(jnp.float32))
    w2_aug = w2_aug.at[hidden, :out_dim].set(b2.astype(jnp.float32))

    # --- Augment x with a ones column and pad the batch to a multiple of the tile.
    x_aug = jnp.concatenate(
        [x.astype(jnp.float32), jnp.ones((B, 1), jnp.float32)], axis=1)
    if B > tile_b:
        tb = tile_b
    else:
        tb = _round_up(B, 8)
    B_pad = _round_up(B, tb)
    if B_pad != B:
        x_aug = jnp.pad(x_aug, ((0, B_pad - B), (0, 0)))

    grid = (B_pad // tb,)

    cost = pl.CostEstimate(
        flops=2 * B_pad * k_aug * H_PAD + 2 * B_pad * H_PAD * O_PAD,
        transcendentals=0,
        bytes_accessed=4 * (B_pad * k_aug + k_aug * H_PAD + H_PAD * O_PAD
                            + B_pad * O_PAD),
    )

    out_padded = pl.pallas_call(
        _mlp_kernel,
        out_shape=jax.ShapeDtypeStruct((B_pad, O_PAD), jnp.float32),
        grid=grid,
        in_specs=[
            pl.BlockSpec((tb, k_aug), lambda i: (i, 0)),      # x tile (batch grid)
            pl.BlockSpec((k_aug, H_PAD), lambda i: (0, 0)),   # W1' (resident)
            pl.BlockSpec((H_PAD, O_PAD), lambda i: (0, 0)),   # W2' (resident)
        ],
        out_specs=pl.BlockSpec((tb, O_PAD), lambda i: (i, 0)),  # lane-dense output slab
        compiler_params=pltpu.CompilerParams(
            dimension_semantics=("parallel",)),
        cost_estimate=cost,
    )(x_aug, w1_aug, w2_aug)

    # Slice back to the public (B, out_dim) shape.
    return out_padded[:B, :out_dim]


def _reference(x, w1, b1, w2, b2):
    h = jnp.maximum(x @ w1 + b1, 0.0)
    return h @ w2 + b2


if __name__ == "__main__":
    # Iris-like dims: 4 input features, 3 classes, small hidden layer.
    input_dim, hidden_dim, output_dim = 4, 32, 3
    batch = 8

    key = jax.random.PRNGKey(0)
    kx, kw1, kb1, kw2, kb2 = jax.random.split(key, 5)

    x = jax.random.normal(kx, (batch, input_dim), dtype=jnp.float32)
    # Deterministic parameter init (mimics nn.Linear's uniform(-1/sqrt(fan_in), ...)).
    lim1 = 1.0 / (input_dim ** 0.5)
    lim2 = 1.0 / (hidden_dim ** 0.5)
    w1 = jax.random.uniform(kw1, (input_dim, hidden_dim), jnp.float32, -lim1, lim1)
    b1 = jax.random.uniform(kb1, (hidden_dim,), jnp.float32, -lim1, lim1)
    w2 = jax.random.uniform(kw2, (hidden_dim, output_dim), jnp.float32, -lim2, lim2)
    b2 = jax.random.uniform(kb2, (output_dim,), jnp.float32, -lim2, lim2)

    out = iris_classifier_forward(x, w1, b1, w2, b2)
    out = jax.block_until_ready(out)

    ref = _reference(x, w1, b1, w2, b2)
    assert out.shape == (batch, output_dim)
    assert jnp.allclose(out, ref, atol=1e-5, rtol=1e-5)

    print("KERNEL_OK")
</pallas_src>

<mosaic_0001>
module attributes {stable_mosaic.version = 11 : i64} {
  func.func @_mlp_kernel(%arg0: i32, %arg1: memref<8x5xf32, #tpu.memory_space<vmem>>, %arg2: memref<5x128xf32, #tpu.memory_space<vmem>>, %arg3: memref<128x128xf32, #tpu.memory_space<vmem>>, %arg4: memref<8x128xf32, #tpu.memory_space<vmem>>) attributes {dimension_semantics = [#tpu.dimension_semantics<parallel>], iteration_bounds = array<i64: 1>, scalar_prefetch = 0 : i64, scratch_operands = 0 : i64, tpu.core_type = #tpu.core_type<tc>, window_params = [{transform_indices = @transform_0, window_bounds = array<i64: 8, 5>}, {pipeline_mode = #tpu.pipeline_mode<synchronous>, transform_indices = @transform_1, window_bounds = array<i64: 5, 128>}, {pipeline_mode = #tpu.pipeline_mode<synchronous>, transform_indices = @transform_2, window_bounds = array<i64: 128, 128>}, {transform_indices = @transform_3, window_bounds = array<i64: 8, 128>}]} {
    %c0 = arith.constant 0 : index
    %c0_0 = arith.constant 0 : index
    %0 = vector.load %arg1[%c0, %c0_0] : memref<8x5xf32, #tpu.memory_space<vmem>>, vector<8x5xf32>
    %c0_1 = arith.constant 0 : index
    %c0_2 = arith.constant 0 : index
    %1 = vector.load %arg2[%c0_1, %c0_2] : memref<5x128xf32, #tpu.memory_space<vmem>>, vector<5x128xf32>
    %cst = arith.constant dense<0.000000e+00> : vector<8x128xf32>
    %2 = tpu.matmul %0, %1, %cst {dimension_numbers = #tpu.dot_dimension_numbers<[1], [0], [0], [1], [0, 0, 1, 1], [], []>} : vector<8x5xf32>, vector<5x128xf32>, vector<8x128xf32> -> vector<8x128xf32>
    %cst_3 = arith.constant 0.000000e+00 : f32
    %3 = vector.broadcast %cst_3 : f32 to vector<8x128xf32>
    %4 = arith.maximumf %2, %3 : vector<8x128xf32>
    %c0_4 = arith.constant 0 : index
    %c0_5 = arith.constant 0 : index
    %5 = vector.load %arg3[%c0_4, %c0_5] : memref<128x128xf32, #tpu.memory_space<vmem>>, vector<128x128xf32>
    %cst_6 = arith.constant dense<0.000000e+00> : vector<8x128xf32>
    %6 = tpu.matmul %4, %5, %cst_6 {dimension_numbers = #tpu.dot_dimension_numbers<[1], [0], [0], [1], [0, 0, 1, 1], [], []>} : vector<8x128xf32>, vector<128x128xf32>, vector<8x128xf32> -> vector<8x128xf32>
    %c0_7 = arith.constant 0 : index
    %c0_8 = arith.constant 0 : index
    %7 = vector.load %arg4[%c0_7, %c0_8] : memref<8x128xf32, #tpu.memory_space<vmem>>, vector<8x128xf32>
    tpu.vector_store %arg4[%c0_7, %c0_8], %6 {strides = array<i32>} : memref<8x128xf32, #tpu.memory_space<vmem>>, vector<8x128xf32>,
    return
  }
  func.func @transform_0(%arg0: i32) -> (i32, i32) {
    %c0_i32 = arith.constant 0 : i32
    %c0_i32_0 = arith.constant 0 : i32
    return %arg0, %c0_i32 : i32, i32
  }
  func.func @transform_1(%arg0: i32) -> (i32, i32) {
    %c0_i32 = arith.constant 0 : i32
    %c0_i32_0 = arith.constant 0 : i32
    %c0_i32_1 = arith.constant 0 : i32
    return %c0_i32, %c0_i32_0 : i32, i32
  }
  func.func @transform_2(%arg0: i32) -> (i32, i32) {
    %c0_i32 = arith.constant 0 : i32
    %c0_i32_0 = arith.constant 0 : i32
    %c0_i32_1 = arith.constant 0 : i32
    return %c0_i32, %c0_i32_0 : i32, i32
  }
  func.func @transform_3(%arg0: i32) -> (i32, i32) {
    %c0_i32 = arith.constant 0 : i32
    %c0_i32_0 = arith.constant 0 : i32
    return %arg0, %c0_i32 : i32, i32
  }
}

</mosaic_0001>

<bundles_post_ra>
// kernel: tpu_custom_call.1
= control target key start
LH: loop header
LB: loop body
LE: loop exit
PB: predicated region body
PF: predicated region fallthrough
CT: control target
= control target key end

     0   :  { %8 = vsyncpa [#allocation3], 0  ;;  %s501_s0 = inlined_call_operand.hbm [shape: f32[8,5], index: 0, kind: input, shape index: {}]   ;;  %s502_s1 = inlined_call_operand.hbm [shape: f32[5,128], index: 1, kind: input, shape index: {}]   ;;  %s503_s2 = inlined_call_operand.hbm [shape: f32[128,128], index: 2, kind: input, shape index: {}]   ;;  %s504_s3 = inlined_call_operand.hbm [shape: f32[8,128], index: 3, kind: output, shape index: {}]  }
   0x1   :  { %9 = vsyncpa [#allocation6], 0 }
   0x2   :  { %10 = vsyncpa [#allocation4], 0  ;;  %s424_s12 = smov [#allocation5]   ;;  %s425_s14 = smov [#allocation2]  }
   0x3   :  { %s27_s13 = sshll.u32 %s424_s12, 4  ;;  %s17_s15 = sshll.u32 %s425_s14, 4  ;;  %s28_s13 = int_to_ptr.vmem [resolvable:$true] %s27_s13  ;;  %s18_s15 = int_to_ptr.vmem [resolvable:$true] %s17_s15 }
   0x4   :  { %s330_s18 = scalar_lea.hbm %s502_s1, 128 }
   0x5   :  { %p331_p0 = scmp.ne.s32.totalorder %s502_s1, %s330_s18  ;;  %p334_p1 = scmp.lt.u32.totalorder %s330_s18, %s502_s1 }
   0x7   :  { %p336_p2 = pnand %p334_p1, %p331_p0 }
   0x9   :  { %339 = shalt.err (!%p336_p2)
}
   0xa   :  { %s340_s23 = scalar_lea.vmem %s28_s13, 128  ;;  %p345_p4 = scmp.lt.s32.totalorder %s28_s13, %s28_s13 }
   0xb   :  { %p341_p3 = scmp.ne.s32.totalorder %s28_s13, %s340_s23  ;;  %p346_p5 = scmp.lt.s32.totalorder %s340_s23, %s340_s23 }
   0xd   :  { %p347_p6 = por %p346_p5, %p345_p4 }
   0xf   :  { %p348_p7 = pnand %p347_p6, %p341_p3 }
  0x11   :  { %351 = shalt.err (!%p348_p7)
}
  0x12   :  { %30 = dma.hbm_to_vmem [thread:$0]  %s502_s1, 128, %s28_s13, [#allocation6]  }
  0x13   :  { %s352_s28 = scalar_lea.hbm %s501_s0, 128 }
  0x14   :  { %p353_p8 = scmp.ne.s32.totalorder %s501_s0, %s352_s28  ;;  %p356_p9 = scmp.lt.u32.totalorder %s352_s28, %s501_s0 }
  0x16   :  { %p358_p10 = pnand %p356_p9, %p353_p8 }
  0x18   :  { %361 = shalt.err (!%p358_p10)
}
  0x19   :  { %s362_s6 = scalar_lea.vmem %s18_s15, 128  ;;  %p367_p12 = scmp.lt.s32.totalorder %s18_s15, %s18_s15 }
  0x1a   :  { %p363_p11 = scmp.ne.s32.totalorder %s18_s15, %s362_s6  ;;  %p368_p13 = scmp.lt.s32.totalorder %s362_s6, %s362_s6 }
  0x1c   :  { %p369_p0 = por %p368_p13, %p367_p12 }
  0x1e   :  { %p370_p1 = pnand %p369_p0, %p363_p11 }
  0x20   :  { %373 = shalt.err (!%p370_p1)
}
  0x21   :  { %20 = dma.hbm_to_vmem [thread:$0]  %s501_s0, 128, %s18_s15, [#allocation3]  }
  0x22   :  { %s426_s8 = smov [#allocation7]   ;;  %s374_s12 = scalar_lea.hbm %s503_s2, 2048 }
  0x23   :  { %s36_s9 = sshll.u32 %s426_s8, 4  ;;  %p375_p2 = scmp.ne.s32.totalorder %s503_s2, %s374_s12  ;;  %s37_s9 = int_to_ptr.vmem [resolvable:$true] %s36_s9 }
  0x24   :  { %p378_p3 = scmp.lt.u32.totalorder %s374_s12, %s503_s2 }
  0x26   :  { %p380_p4 = pnand %p378_p3, %p375_p2 }
  0x28   :  { %383 = shalt.err (!%p380_p4)
}
  0x29   :  { %s384_s18 = scalar_lea.vmem %s37_s9, 2048  ;;  %p389_p6 = scmp.lt.s32.totalorder %s37_s9, %s37_s9 }
  0x2a   :  { %p385_p5 = scmp.ne.s32.totalorder %s37_s9, %s384_s18  ;;  %p390_p7 = scmp.lt.s32.totalorder %s384_s18, %s384_s18 }
  0x2c   :  { %p391_p8 = por %p390_p7, %p389_p6 }
  0x2e   :  { %p392_p9 = pnand %p391_p8, %p385_p5 }
  0x30   :  { %395 = shalt.err (!%p392_p9)
}
  0x31   :  { %s427_s0 = smov 128   ;;  %s428_s15 = smov 8  }
  0x32   :  { %42 = dma.hbm_to_vmem [thread:$0]  %s503_s2, 2048, %s37_s9, [#allocation6], %s427_s0, %s427_s0, %s428_s15  }
  0x33   :  { %418 = dma.done.wait [#allocation3], 128  }
  0x34   :  { %419 = vsyncadd [#allocation3], 4294967168 }
  0x35   :  { %420 = dma.done.wait [#allocation6], 2176  }
  0x36   :  { %421 = vsyncadd [#allocation6], 4294965120  ;;  %v429_v0 = vmov 0.0   ;;  %vm430_vm0 = vmmov 0   ;;  %v431_v1 = vmov 0.0|0.0   ;;  %vm58_vm1 = vcmask 1044480  }
  0x37   :  { %257 = vmatprep.subr.mxu0 %v429_v0  ;;  %259 = vmatprep.mubr.msk.f32.mxu0 %vm430_vm0, %v429_v0  ;;  %vm54_vm2 = vcmask 39936   ;;  %v53_v2 = vld [vmem:[#allocation5] sm:$0x1f]  ;;  %v52_v3 = vld [vmem:[#allocation2] sm:$0xff]  ;;  %v133_v4 = vld [vmem:[#allocation7] sm:$0xff]  ;;  %s432_s2 = smov [#allocation8]  }
  0x38   :  { %297 = vmatprep.subr.bf16.mxu1 %v431_v1  ;;  %294 = vmatprep.mubr.msk.f32.mxu1 %vm430_vm0, %v429_v0  ;;  %v134_v5 = vld [vmem:[#allocation7 + $0x8] sm:$0xff]  ;;  %v135_v6 = vld [vmem:[#allocation7 + $0x10] sm:$0xff]  ;;  %v136_v7 = vld [vmem:[#allocation7 + $0x18] sm:$0xff]  ;;  %s226_s21 = sshll.u32 %s432_s2, 4  ;;  %s227_s21 = int_to_ptr.vmem [resolvable:$true] %s226_s21 }
  0x39   :  { %258 = vmatpush3.msk.msra.mxu0 %vm58_vm1, %v53_v2  ;;  %v298_v8 = vpack.c.bf16 %v134_v5, %v133_v4  ;;  %v301_v9 = vpack.c.bf16 %v136_v7, %v135_v6  ;;  %v137_v10 = vld [vmem:[#allocation7 + $0x20] sm:$0xff]  ;;  %v138_v11 = vld [vmem:[#allocation7 + $0x28] sm:$0xff]  ;;  %v139_v13 = vld [vmem:[#allocation7 + $0x30] sm:$0xff]  ;;  %s396_s22 = scalar_lea.vmem %s227_s21, 128  ;;  %p401_p11 = scmp.lt.s32.totalorder %s227_s21, %s227_s21 }
  0x3a   :  { %260 = vmatmul.mubr.msk.f32.vlgmr.msra.gmra.mrb[0].mxu0 %vm54_vm2, %v52_v3  ;;  %v304_v12 = vpack.c.bf16 %v138_v11, %v137_v10  ;;  %v140_v14 = vld [vmem:[#allocation7 + $0x38] sm:$0xff]  ;;  %v141_v16 = vld [vmem:[#allocation7 + $0x40] sm:$0xff]  ;;  %v142_v17 = vld [vmem:[#allocation7 + $0x48] sm:$0xff]  ;;  %p397_p10 = scmp.ne.s32.totalorder %s227_s21, %s396_s22  ;;  %p402_p12 = scmp.lt.s32.totalorder %s396_s22, %s396_s22 }
  0x3b   :  { %299 = vmatpush3.bf16.msra.mxu1 %v298_v8  ;;  %v307_v15 = vpack.c.bf16 %v140_v14, %v139_v13  ;;  %v310_v18 = vpack.c.bf16 %v142_v17, %v141_v16  ;;  %v143_v19 = vld [vmem:[#allocation7 + $0x50] sm:$0xff]  ;;  %v144_v20 = vld [vmem:[#allocation7 + $0x58] sm:$0xff]  ;;  %v145_v22 = vld [vmem:[#allocation7 + $0x60] sm:$0xff] }
  0x3c   :  { %300 = vmatprep.subr.bf16.mxu1 %v431_v1  ;;  %v313_v21 = vpack.c.bf16 %v144_v20, %v143_v19  ;;  %v146_v23 = vld [vmem:[#allocation7 + $0x68] sm:$0xff]  ;;  %v147_v25 = vld [vmem:[#allocation7 + $0x70] sm:$0xff]  ;;  %v148_v26 = vld [vmem:[#allocation7 + $0x78] sm:$0xff]  ;;  %p403_p13 = por %p402_p12, %p401_p11 }
  0x3d   :  { %v316_v24 = vpack.c.bf16 %v146_v23, %v145_v22  ;;  %v319_v27 = vpack.c.bf16 %v148_v26, %v147_v25 }
  0x3e   :  { %p404_p0 = pnand %p403_p13, %p397_p10 }
  0x3f   :  { %302 = vmatpush3.bf16.msra.mxu1 %v301_v9 }
  0x40   :  { %303 = vmatprep.subr.bf16.mxu1 %v431_v1 }
  0x43   :  { %305 = vmatpush3.bf16.msra.mxu1 %v304_v12 }
  0x44   :  { %306 = vmatprep.subr.bf16.mxu1 %v431_v1 }
  0x47   :  { %308 = vmatpush3.bf16.msra.mxu1 %v307_v15 }
  0x48   :  { %309 = vmatprep.subr.bf16.mxu1 %v431_v1 }
  0x4b   :  { %311 = vmatpush3.bf16.msra.mxu1 %v310_v18 }
  0x4c   :  { %312 = vmatprep.subr.bf16.mxu1 %v431_v1 }
  0x4f   :  { %314 = vmatpush3.bf16.msra.mxu1 %v313_v21 }
  0x50   :  { %315 = vmatprep.subr.bf16.mxu1 %v431_v1 }
  0x53   :  { %317 = vmatpush3.bf16.msra.mxu1 %v316_v24 }
  0x54   :  { %318 = vmatprep.subr.bf16.mxu1 %v431_v1 }
  0x57   :  { %320 = vmatpush3.bf16.msra.mxu1 %v319_v27 }
 0x10d   :  { %v128_v28 = vpop.f32.mrb[0].mxu0 }
 0x10e   :  { %v132_v29 = vmax.f32 %v128_v28, 0.0  ;;  %v261_v30 = vpop.f32.mrb[1].mxu0 }
 0x110   :  { %295 = vmatmul.mubr.f32.vlgmr.msra.gmra.mrb[0].mxu1 %v132_v29 }
 0x1e3   :  { %v215_v31 = vpop.f32.mrb[0].mxu1 }
 0x1e4   :  { %219 = vst [vmem:[#allocation8] sm:$0xff] %v215_v31  ;;  %v296_v32 = vpop.f32.mrb[1].mxu1 }
 0x1e5   :  { %407 = shalt.err (!%p404_p0)
}
 0x1e6   :  { %s408_s25 = scalar_lea.hbm %s504_s3, 128 }
 0x1e7   :  { %p409_p1 = scmp.ne.s32.totalorder %s504_s3, %s408_s25  ;;  %p412_p2 = scmp.lt.u32.totalorder %s408_s25, %s504_s3 }
 0x1e9   :  { %p414_p3 = pnand %p412_p2, %p409_p1 }
 0x1eb   :  { %417 = shalt.err (!%p414_p3)
}
 0x1ec   :  { %229 = dma.vmem_to_hbm [thread:$0]  %s227_s21, 128, %s504_s3, [#allocation4]  }
 0x1ed   :  { %422 = dma.done.wait [#allocation4], 128  }
 0x1ee   :  { %423 = vsyncadd [#allocation4], 4294967168 }
 0x1ef   :  { %233 = vsyncpa [#allocation3], 1 }
 0x1f0   :  { %234 = vsyncpa [#allocation6], 1 }
 0x1f1   :  { %235 = vsyncpa [#allocation4], 1 }

</bundles_post_ra>
